<compile_context>
chip_gen: v6e
topology: v6e:2x2x1
jax: 0.10.0
libtpu: 0.0.40
codegen_flags: <defaults>
</compile_context>

<pallas_src>
import functools

import numpy as np
import jax
import jax.numpy as jnp
from jax import lax
from jax.experimental import pallas as pl
from jax.experimental.pallas import tpu as pltpu


# -----------------------------------------------------------------------------
# Fused kernel: camera conversion + track normalization
# -----------------------------------------------------------------------------
def _fused_kernel(rtcat_ref, focal_ref, tracks_ref,
                  ext_ref, intri_ref, fl_ref, pp_ref, tn_ref,
                  *, scale, half_w, half_h):
    dt = tn_ref.dtype
    S = rtcat_ref.shape[0]

    # focal_length = focal * scale / 2 ; mean over (fx, fy) ; clamp.
    # Needed every grid step (tn normalization), tiny (S, 2) work.
    fl = focal_ref[...] * jnp.asarray(scale * 0.5, dt)             # (S, 2)
    fmean = (fl[:, 0:1] + fl[:, 1:2]) * jnp.asarray(0.5, dt)       # (S, 1)
    fmean = jnp.clip(fmean,
                     jnp.asarray(0.2 * scale, dt),
                     jnp.asarray(5.0 * scale, dt))

    # ---- camera portion (tiny tensors): write once, stay VMEM-resident -----
    @pl.when(pl.program_id(0) == 0)
    def _():
        # extrinsics: Rots[:,:,:2]*=-1; Trans[:,:2]*=-1; Rots^T; cat
        #   == flip rows 0,1 of the pre-concatenated [R^T | T] slab.
        rt = rtcat_ref[...]                                        # (S, 3, 4)
        row = lax.broadcasted_iota(jnp.int32, rt.shape, 1)
        ext_ref[...] = jnp.where(row < 2, -rt, rt)

        # focal_length output (mean broadcast to both components)
        fl_ref[...] = jnp.broadcast_to(fmean, (S, 2))

        # principal_point = image_size / 2  -> [W/2, H/2] per frame
        col2 = lax.broadcasted_iota(jnp.int32, (S, 2), 1)
        pp_ref[...] = jnp.where(col2 == 0,
                                jnp.asarray(half_w, dt),
                                jnp.asarray(half_h, dt))

        # intrinsics K = [[f, 0, cx], [0, f, cy], [0, 0, 1]] per frame
        r = lax.broadcasted_iota(jnp.int32, (S, 3, 3), 1)
        c = lax.broadcasted_iota(jnp.int32, (S, 3, 3), 2)
        f_b = jnp.broadcast_to(fmean[:, :, None], (S, 3, 3))
        K = jnp.where((r == c) & (r < 2), f_b, jnp.zeros((S, 3, 3), dt))
        K = jnp.where((r == 0) & (c == 2), jnp.asarray(half_w, dt), K)
        K = jnp.where((r == 1) & (c == 2), jnp.asarray(half_h, dt), K)
        K = jnp.where((r == 2) & (c == 2), jnp.asarray(1.0, dt), K)
        intri_ref[...] = K

    # ---- track normalization hot path ---------------------------------------
    # tracks block: (S, lane_tile) with x/y interleaved on the lane axis.
    # pp per lane = half_w on even lanes (x), half_h on odd lanes (y);
    # one exact reciprocal per frame turns the inner loop into sub + mul.
    t = tracks_ref[...]
    lane = lax.broadcasted_iota(jnp.int32, t.shape, 1)
    pp_pat = jnp.where((lane & 1) == 0,
                       jnp.asarray(half_w, dt),
                       jnp.asarray(half_h, dt))
    inv_f = jnp.asarray(1.0, dt) / fmean                           # (S, 1) exact
    tn_ref[...] = (t - pp_pat) * inv_f


# -----------------------------------------------------------------------------
# Triangulator forward (numeric portion)
# -----------------------------------------------------------------------------
def triangulator_forward(R, T, focal, pred_tracks, image_hw, *, max_lane_tile=4096):
    """
    R: (S,3,3), T: (S,3), focal: (S,2)  -- pred_cameras (NOTE: no learnable
    params in VGGSfM v1.1, matching the module's __init__).
    pred_tracks: (B, S, N, 2) in pixels, B == 1.
    image_hw: (H, W) from images.shape.
    Returns extrinsics (B,S,3,4), intrinsics (B,S,3,3), focal_length (B,S,2),
            principal_point (B,S,2), tracks_normalized (B,S,N,2).
    """
    H, W = image_hw
    B, S, N, _ = pred_tracks.shape
    assert B == 1
    dt = pred_tracks.dtype
    scale = float(min(W, H))
    half_w, half_h = float(W) / 2.0, float(H) / 2.0

    # TODO(synk): transform_camera_relative_to_first not reproduced (identity).

    # layout glue only (no arithmetic): [R^T | T] in one (S,3,4) slab
    rt_cat = jnp.concatenate(
        [jnp.swapaxes(R, -1, -2), T[:, :, None]], axis=-1).astype(dt)
    focal = focal.astype(dt)

    # native layout: (S, N, 2) -> (S, 2N) is a free contiguous reshape
    # (no transpose passes over the track data).
    two_n = 2 * N
    tracks_flat = pred_tracks[0].reshape(S, two_n)

    if two_n <= max_lane_tile:
        lane_tile = two_n          # one block, whole slab resident in VMEM
        grid_n = 1
    else:
        lane_tile = max_lane_tile  # multiple of 128 and even (keeps x/y parity)
        grid_n = pl.cdiv(two_n, lane_tile)

    kern = functools.partial(_fused_kernel, scale=scale,
                             half_w=half_w, half_h=half_h)

    out_shape = (jax.ShapeDtypeStruct((S, 3, 4), dt),
                 jax.ShapeDtypeStruct((S, 3, 3), dt),
                 jax.ShapeDtypeStruct((S, 2), dt),
                 jax.ShapeDtypeStruct((S, 2), dt),
                 jax.ShapeDtypeStruct((S, two_n), dt))

    ext, intri, fl, pp, tn_flat = pl.pallas_call(
        kern,
        out_shape=out_shape,
        grid=(grid_n,),
        in_specs=[pl.BlockSpec((S, 3, 4), lambda n: (0, 0, 0)),
                  pl.BlockSpec((S, 2), lambda n: (0, 0)),
                  pl.BlockSpec((S, lane_tile), lambda n: (0, n))],
        out_specs=(pl.BlockSpec((S, 3, 4), lambda n: (0, 0, 0)),
                   pl.BlockSpec((S, 3, 3), lambda n: (0, 0, 0)),
                   pl.BlockSpec((S, 2), lambda n: (0, 0)),
                   pl.BlockSpec((S, 2), lambda n: (0, 0)),
                   pl.BlockSpec((S, lane_tile), lambda n: (0, n))),
        compiler_params=pltpu.CompilerParams(
            dimension_semantics=("arbitrary",),
            vmem_limit_bytes=64 << 20),
    )(rt_cat, focal, tracks_flat)

    tracks_normalized = tn_flat.reshape(S, N, 2)[None]
    return ext[None], intri[None], fl[None], pp[None], tracks_normalized


# -----------------------------------------------------------------------------
# Pure-JAX reference (mirrors the PyTorch semantics) for verification
# -----------------------------------------------------------------------------
def _reference(R, T, focal, pred_tracks, image_hw):
    H, W = image_hw
    scale = float(min(W, H))
    fl = focal * scale / 2.0
    pp = jnp.broadcast_to(jnp.array([W / 2.0, H / 2.0], jnp.float32), fl.shape)
    col_sign = jnp.array([-1.0, -1.0, 1.0], jnp.float32)
    Rf = R * col_sign[None, None, :]
    Tf = T * col_sign[None, :]
    ext = jnp.concatenate([jnp.swapaxes(Rf, -1, -2), Tf[:, :, None]], axis=-1)
    fmean = fl.mean(-1, keepdims=True)
    fl2 = jnp.clip(jnp.broadcast_to(fmean, fl.shape), 0.2 * scale, 5.0 * scale)
    S = R.shape[0]
    K = (jnp.zeros((S, 3, 3), jnp.float32)
         .at[:, 0, 0].set(fl2[:, 0]).at[:, 1, 1].set(fl2[:, 1])
         .at[:, 0, 2].set(pp[:, 0]).at[:, 1, 2].set(pp[:, 1])
         .at[:, 2, 2].set(1.0))
    tn = (pred_tracks - pp[None, :, None, :]) / fl2[None, :, None, :]
    return ext[None], K[None], fl2[None], pp[None], tn


if __name__ == "__main__":
    key = jax.random.PRNGKey(0)
    B, S, N, H, W = 1, 8, 256, 64, 64
    k1, k2, k3, k4 = jax.random.split(key, 4)

    R = jax.random.normal(k1, (S, 3, 3), dtype=jnp.float32)
    T = jax.random.normal(k2, (S, 3), dtype=jnp.float32)
    focal = jax.random.uniform(k3, (S, 2), dtype=jnp.float32, minval=0.5, maxval=2.0)
    pred_tracks = jax.random.uniform(k4, (B, S, N, 2), dtype=jnp.float32,
                                     minval=0.0, maxval=float(W))

    outs = triangulator_forward(R, T, focal, pred_tracks, (H, W))
    outs = jax.block_until_ready(outs)

    refs = _reference(R, T, focal, pred_tracks, (H, W))
    for o, r in zip(outs, refs):
        np.testing.assert_allclose(np.asarray(o), np.asarray(r), rtol=1e-5, atol=1e-5)

    print("KERNEL_OK")
</pallas_src>

<mosaic_0001>
module attributes {stable_mosaic.version = 11 : i64} {
  func.func @_fused_kernel(%arg0: i32, %arg1: memref<8x3x4xf32, #tpu.memory_space<vmem>>, %arg2: memref<8x2xf32, #tpu.memory_space<vmem>>, %arg3: memref<8x512xf32, #tpu.memory_space<vmem>>, %arg4: memref<8x3x4xf32, #tpu.memory_space<vmem>>, %arg5: memref<8x3x3xf32, #tpu.memory_space<vmem>>, %arg6: memref<8x2xf32, #tpu.memory_space<vmem>>, %arg7: memref<8x2xf32, #tpu.memory_space<vmem>>, %arg8: memref<8x512xf32, #tpu.memory_space<vmem>>) attributes {dimension_semantics = [#tpu.dimension_semantics<arbitrary>], iteration_bounds = array<i64: 1>, scalar_prefetch = 0 : i64, scratch_operands = 0 : i64, tpu.core_type = #tpu.core_type<tc>, window_params = [{pipeline_mode = #tpu.pipeline_mode<synchronous>, transform_indices = @transform_0, window_bounds = array<i64: 8, 3, 4>}, {pipeline_mode = #tpu.pipeline_mode<synchronous>, transform_indices = @transform_1, window_bounds = array<i64: 8, 2>}, {transform_indices = @transform_2, window_bounds = array<i64: 8, 512>}, {pipeline_mode = #tpu.pipeline_mode<synchronous>, transform_indices = @transform_3, window_bounds = array<i64: 8, 3, 4>}, {pipeline_mode = #tpu.pipeline_mode<synchronous>, transform_indices = @transform_4, window_bounds = array<i64: 8, 3, 3>}, {pipeline_mode = #tpu.pipeline_mode<synchronous>, transform_indices = @transform_5, window_bounds = array<i64: 8, 2>}, {pipeline_mode = #tpu.pipeline_mode<synchronous>, transform_indices = @transform_6, window_bounds = array<i64: 8, 2>}, {transform_indices = @transform_7, window_bounds = array<i64: 8, 512>}]} {
    %c0 = arith.constant 0 : index
    %c0_0 = arith.constant 0 : index
    %0 = vector.load %arg2[%c0, %c0_0] : memref<8x2xf32, #tpu.memory_space<vmem>>, vector<8x2xf32>
    %cst = arith.constant 3.200000e+01 : f32
    %1 = vector.broadcast %cst : f32 to vector<8x2xf32>
    %2 = arith.mulf %0, %1 : vector<8x2xf32>
    %3 = vector.extract_strided_slice %2 {offsets = [0, 0], sizes = [8, 1], strides = [1, 1]} : vector<8x2xf32> to vector<8x1xf32>
    %4 = vector.extract_strided_slice %2 {offsets = [0, 1], sizes = [8, 1], strides = [1, 1]} : vector<8x2xf32> to vector<8x1xf32>
    %5 = arith.addf %3, %4 : vector<8x1xf32>
    %cst_1 = arith.constant 5.000000e-01 : f32
    %6 = vector.broadcast %cst_1 : f32 to vector<8x1xf32>
    %7 = arith.mulf %5, %6 : vector<8x1xf32>
    %cst_2 = arith.constant 1.280000e+01 : f32
    %cst_3 = arith.constant 3.200000e+02 : f32
    %8 = vector.broadcast %cst_2 : f32 to vector<8x1xf32>
    %9 = arith.maximumf %8, %7 : vector<8x1xf32>
    %10 = vector.broadcast %cst_3 : f32 to vector<8x1xf32>
    %11 = arith.minimumf %10, %9 : vector<8x1xf32>
    %c0_i32 = arith.constant 0 : i32
    %12 = arith.cmpi eq, %arg0, %c0_i32 : i32
    %13 = arith.extui %12 : i1 to i32
    %c0_i32_4 = arith.constant 0 : i32
    %14 = arith.cmpi ne, %13, %c0_i32_4 : i32
    scf.if %14 {
      %c0_13 = arith.constant 0 : index
      %c0_14 = arith.constant 0 : index
      %c0_15 = arith.constant 0 : index
      %30 = vector.load %arg1[%c0_13, %c0_14, %c0_15] : memref<8x3x4xf32, #tpu.memory_space<vmem>>, vector<8x3x4xf32>
      %31 = tpu.iota {dimensions = array<i32: 1>} : vector<8x3x4xi32>
      %c2_i32 = arith.constant 2 : i32
      %32 = vector.broadcast %c2_i32 : i32 to vector<8x3x4xi32>
      %33 = arith.cmpi slt, %31, %32 : vector<8x3x4xi32>
      %cst_16 = arith.constant 0.000000e+00 : f32
      %34 = vector.broadcast %cst_16 : f32 to vector<8x3x4xf32>
      %35 = arith.subf %34, %30 : vector<8x3x4xf32>
      %36 = arith.select %33, %35, %30 : vector<8x3x4xi1>, vector<8x3x4xf32>
      %c0_17 = arith.constant 0 : index
      %c0_18 = arith.constant 0 : index
      %c0_19 = arith.constant 0 : index
      %37 = vector.load %arg4[%c0_17, %c0_18, %c0_19] : memref<8x3x4xf32, #tpu.memory_space<vmem>>, vector<8x3x4xf32>
      tpu.vector_store %arg4[%c0_17, %c0_18, %c0_19], %36 {strides = array<i32>} : memref<8x3x4xf32, #tpu.memory_space<vmem>>, vector<8x3x4xf32>,
      %38 = vector.shape_cast %11 : vector<8x1xf32> to vector<8x1xf32>
      %39 = vector.broadcast %38 : vector<8x1xf32> to vector<8x2xf32>
      %c0_20 = arith.constant 0 : index
      %c0_21 = arith.constant 0 : index
      %40 = vector.load %arg6[%c0_20, %c0_21] : memref<8x2xf32, #tpu.memory_space<vmem>>, vector<8x2xf32>
      tpu.vector_store %arg6[%c0_20, %c0_21], %39 {strides = array<i32>} : memref<8x2xf32, #tpu.memory_space<vmem>>, vector<8x2xf32>,
      %41 = tpu.iota {dimensions = array<i32: 1>} : vector<8x2xi32>
      %c0_i32_22 = arith.constant 0 : i32
      %42 = vector.broadcast %c0_i32_22 : i32 to vector<8x2xi32>
      %43 = arith.cmpi eq, %41, %42 : vector<8x2xi32>
      %cst_23 = arith.constant 3.200000e+01 : f32
      %cst_24 = arith.constant 3.200000e+01 : f32
      %44 = vector.broadcast %cst_23 : f32 to vector<8x2xf32>
      %45 = vector.broadcast %cst_24 : f32 to vector<8x2xf32>
      %46 = arith.select %43, %44, %45 : vector<8x2xi1>, vector<8x2xf32>
      %c0_25 = arith.constant 0 : index
      %c0_26 = arith.constant 0 : index
      %47 = vector.load %arg7[%c0_25, %c0_26] : memref<8x2xf32, #tpu.memory_space<vmem>>, vector<8x2xf32>
      tpu.vector_store %arg7[%c0_25, %c0_26], %46 {strides = array<i32>} : memref<8x2xf32, #tpu.memory_space<vmem>>, vector<8x2xf32>,
      %48 = tpu.iota {dimensions = array<i32: 1>} : vector<8x3x3xi32>
      %49 = tpu.iota {dimensions = array<i32: 2>} : vector<8x3x3xi32>
      %50 = vector.shape_cast %11 : vector<8x1xf32> to vector<8x1x1xf32>
      %51 = vector.shape_cast %50 : vector<8x1x1xf32> to vector<8x1x1xf32>
      %52 = vector.broadcast %51 : vector<8x1x1xf32> to vector<8x3x3xf32>
      %53 = arith.cmpi eq, %48, %49 : vector<8x3x3xi32>
      %c2_i32_27 = arith.constant 2 : i32
      %54 = vector.broadcast %c2_i32_27 : i32 to vector<8x3x3xi32>
      %55 = arith.cmpi slt, %48, %54 : vector<8x3x3xi32>
      %56 = arith.andi %53, %55 : vector<8x3x3xi1>
      %cst_28 = arith.constant 0.000000e+00 : f32
      %57 = vector.broadcast %cst_28 : f32 to vector<8x3x3xf32>
      %58 = arith.select %56, %52, %57 : vector<8x3x3xi1>, vector<8x3x3xf32>
      %c0_i32_29 = arith.constant 0 : i32
      %59 = vector.broadcast %c0_i32_29 : i32 to vector<8x3x3xi32>
      %60 = arith.cmpi eq, %48, %59 : vector<8x3x3xi32>
      %c2_i32_30 = arith.constant 2 : i32
      %61 = vector.broadcast %c2_i32_30 : i32 to vector<8x3x3xi32>
      %62 = arith.cmpi eq, %49, %61 : vector<8x3x3xi32>
      %63 = arith.andi %60, %62 : vector<8x3x3xi1>
      %cst_31 = arith.constant 3.200000e+01 : f32
      %64 = vector.broadcast %cst_31 : f32 to vector<8x3x3xf32>
      %65 = arith.select %63, %64, %58 : vector<8x3x3xi1>, vector<8x3x3xf32>
      %c1_i32_32 = arith.constant 1 : i32
      %66 = vector.broadcast %c1_i32_32 : i32 to vector<8x3x3xi32>
      %67 = arith.cmpi eq, %48, %66 : vector<8x3x3xi32>
      %c2_i32_33 = arith.constant 2 : i32
      %68 = vector.broadcast %c2_i32_33 : i32 to vector<8x3x3xi32>
      %69 = arith.cmpi eq, %49, %68 : vector<8x3x3xi32>
      %70 = arith.andi %67, %69 : vector<8x3x3xi1>
      %cst_34 = arith.constant 3.200000e+01 : f32
      %71 = vector.broadcast %cst_34 : f32 to vector<8x3x3xf32>
      %72 = arith.select %70, %71, %65 : vector<8x3x3xi1>, vector<8x3x3xf32>
      %c2_i32_35 = arith.constant 2 : i32
      %73 = vector.broadcast %c2_i32_35 : i32 to vector<8x3x3xi32>
      %74 = arith.cmpi eq, %48, %73 : vector<8x3x3xi32>
      %c2_i32_36 = arith.constant 2 : i32
      %75 = vector.broadcast %c2_i32_36 : i32 to vector<8x3x3xi32>
      %76 = arith.cmpi eq, %49, %75 : vector<8x3x3xi32>
      %77 = arith.andi %74, %76 : vector<8x3x3xi1>
      %cst_37 = arith.constant 1.000000e+00 : f32
      %78 = vector.broadcast %cst_37 : f32 to vector<8x3x3xf32>
      %79 = arith.select %77, %78, %72 : vector<8x3x3xi1>, vector<8x3x3xf32>
      %c0_38 = arith.constant 0 : index
      %c0_39 = arith.constant 0 : index
      %c0_40 = arith.constant 0 : index
      %80 = vector.load %arg5[%c0_38, %c0_39, %c0_40] : memref<8x3x3xf32, #tpu.memory_space<vmem>>, vector<8x3x3xf32>
      tpu.vector_store %arg5[%c0_38, %c0_39, %c0_40], %79 {strides = array<i32>} : memref<8x3x3xf32, #tpu.memory_space<vmem>>, vector<8x3x3xf32>,
    } else {
    }
    %c0_5 = arith.constant 0 : index
    %c0_6 = arith.constant 0 : index
    %15 = vector.load %arg3[%c0_5, %c0_6] : memref<8x512xf32, #tpu.memory_space<vmem>>, vector<8x512xf32>
    %16 = tpu.iota {dimensions = array<i32: 1>} : vector<8x512xi32>
    %c1_i32 = arith.constant 1 : i32
    %17 = vector.broadcast %c1_i32 : i32 to vector<8x512xi32>
    %18 = arith.andi %16, %17 : vector<8x512xi32>
    %c0_i32_7 = arith.constant 0 : i32
    %19 = vector.broadcast %c0_i32_7 : i32 to vector<8x512xi32>
    %20 = arith.cmpi eq, %18, %19 : vector<8x512xi32>
    %cst_8 = arith.constant 3.200000e+01 : f32
    %cst_9 = arith.constant 3.200000e+01 : f32
    %21 = vector.broadcast %cst_8 : f32 to vector<8x512xf32>
    %22 = vector.broadcast %cst_9 : f32 to vector<8x512xf32>
    %23 = arith.select %20, %21, %22 : vector<8x512xi1>, vector<8x512xf32>
    %cst_10 = arith.constant 1.000000e+00 : f32
    %24 = vector.broadcast %cst_10 : f32 to vector<8x1xf32>
    %25 = arith.divf %24, %11 : vector<8x1xf32>
    %26 = arith.subf %15, %23 : vector<8x512xf32>
    %27 = vector.broadcast %25 : vector<8x1xf32> to vector<8x512xf32>
    %28 = arith.mulf %26, %27 : vector<8x512xf32>
    %c0_11 = arith.constant 0 : index
    %c0_12 = arith.constant 0 : index
    %29 = vector.load %arg8[%c0_11, %c0_12] : memref<8x512xf32, #tpu.memory_space<vmem>>, vector<8x512xf32>
    tpu.vector_store %arg8[%c0_11, %c0_12], %28 {strides = array<i32>} : memref<8x512xf32, #tpu.memory_space<vmem>>, vector<8x512xf32>,
    return
  }
  func.func @transform_0(%arg0: i32) -> (i32, i32, i32) {
    %c0_i32 = arith.constant 0 : i32
    %c0_i32_0 = arith.constant 0 : i32
    %c0_i32_1 = arith.constant 0 : i32
    %c0_i32_2 = arith.constant 0 : i32
    return %c0_i32, %c0_i32_0, %c0_i32_1 : i32, i32, i32
  }
  func.func @transform_1(%arg0: i32) -> (i32, i32) {
    %c0_i32 = arith.constant 0 : i32
    %c0_i32_0 = arith.constant 0 : i32
    %c0_i32_1 = arith.constant 0 : i32
    return %c0_i32, %c0_i32_0 : i32, i32
  }
  func.func @transform_2(%arg0: i32) -> (i32, i32) {
    %c0_i32 = arith.constant 0 : i32
    %c0_i32_0 = arith.constant 0 : i32
    return %c0_i32, %arg0 : i32, i32
  }
  func.func @transform_3(%arg0: i32) -> (i32, i32, i32) {
    %c0_i32 = arith.constant 0 : i32
    %c0_i32_0 = arith.constant 0 : i32
    %c0_i32_1 = arith.constant 0 : i32
    %c0_i32_2 = arith.constant 0 : i32
    return %c0_i32, %c0_i32_0, %c0_i32_1 : i32, i32, i32
  }
  func.func @transform_4(%arg0: i32) -> (i32, i32, i32) {
    %c0_i32 = arith.constant 0 : i32
    %c0_i32_0 = arith.constant 0 : i32
    %c0_i32_1 = arith.constant 0 : i32
    %c0_i32_2 = arith.constant 0 : i32
    return %c0_i32, %c0_i32_0, %c0_i32_1 : i32, i32, i32
  }
  func.func @transform_5(%arg0: i32) -> (i32, i32) {
    %c0_i32 = arith.constant 0 : i32
    %c0_i32_0 = arith.constant 0 : i32
    %c0_i32_1 = arith.constant 0 : i32
    return %c0_i32, %c0_i32_0 : i32, i32
  }
  func.func @transform_6(%arg0: i32) -> (i32, i32) {
    %c0_i32 = arith.constant 0 : i32
    %c0_i32_0 = arith.constant 0 : i32
    %c0_i32_1 = arith.constant 0 : i32
    return %c0_i32, %c0_i32_0 : i32, i32
  }
  func.func @transform_7(%arg0: i32) -> (i32, i32) {
    %c0_i32 = arith.constant 0 : i32
    %c0_i32_0 = arith.constant 0 : i32
    return %c0_i32, %arg0 : i32, i32
  }
}

</mosaic_0001>

<bundles_post_ra>
// kernel: tpu_custom_call.1
= control target key start
LH: loop header
LB: loop body
LE: loop exit
PB: predicated region body
PF: predicated region fallthrough
CT: control target
= control target key end

     0   :  { %v331_v2 = vmov 0   ;;  %s571_s0 = inlined_call_operand.vmem [shape: f32[8,3,4], index: 0, kind: input, shape index: {}]   ;;  %s572_s1 = inlined_call_operand.vmem [shape: f32[8,2], index: 1, kind: input, shape index: {}]   ;;  %s573_s2 = inlined_call_operand.vmem [shape: f32[8,512], index: 2, kind: input, shape index: {}]   ;;  %s574_s3 = inlined_call_operand.vmem [shape: f32[8,3,4], index: 3, kind: output, shape index: {0}]   ;;  %s575_s4 = inlined_call_operand.vmem [shape: f32[8,3,3], index: 4, kind: output, shape index: {1}]   ;;  %s576_s5 = inlined_call_operand.vmem [shape: f32[8,2], index: 5, kind: output, shape index: {2}]   ;;  %s577_s6 = inlined_call_operand.vmem [shape: f32[8,2], index: 6, kind: output, shape index: {3}]   ;;  %s578_s7 = inlined_call_operand.hbm [shape: f32[8,512], index: 7, kind: output, shape index: {4}]  }
   0x1   :  { %v20_v0 = vld [vmem:[%s572_s1] sm:$0xff]  ;;  %305 = vset.pattern.permute.xlu0 %v331_v2  ;;  %306 = vset.pattern.permute.xlu1 %v331_v2 }
   0x2   :  { %v21_v1 = vmul.f32 32.0, %v20_v0 }
   0x3   :  { %13 = vsyncpa [#allocation3], 0  ;;  %s332_s26 = smov 127   ;;  %v42_v3 = vlaneseq  ;;  %v34_v5 = vld [vmem:[%s571_s0] sm:$0x7]  ;;  %vm61_vm1 = vcmask 26624  }
   0x4   :  { %23 = vrot.lane.b32.xlu0 %v21_v1, %s332_s26  ;;  %v35_v6 = vld [vmem:[%s571_s0 + $0x4] sm:$0x7]  ;;  %v36_v7 = vld [vmem:[%s571_s0 + $0x8] sm:$0x7]  ;;  %v37_v8 = vld [vmem:[%s571_s0 + $0xc] sm:$0x7] }
   0x5   :  { %v43_v4 = vshrl.u32 %v42_v3, 7  ;;  %v38_v9 = vld [vmem:[%s571_s0 + $0x10] sm:$0x7]  ;;  %v39_v10 = vld [vmem:[%s571_s0 + $0x14] sm:$0x7]  ;;  %v45_v13 = vsub.f32 0.0, %v34_v5 }
   0x6   :  { %v40_v11 = vld [vmem:[%s571_s0 + $0x18] sm:$0x7]  ;;  %v41_v12 = vld [vmem:[%s571_s0 + $0x1c] sm:$0x7]  ;;  %v46_v14 = vsub.f32 0.0, %v35_v6  ;;  %v47_v15 = vsub.f32 0.0, %v36_v7 }
   0x7   :  { %vm44_vm0 = vcmp.lt.s32.totalorder %v43_v4, 2  ;;  %v48_v16 = vsub.f32 0.0, %v37_v8  ;;  %v49_v17 = vsub.f32 0.0, %v38_v9  ;;  %v50_v18 = vsub.f32 0.0, %v39_v10  ;;  %s335_s24 = smov [#allocation2]  }
   0x8   :  { %v51_v19 = vsub.f32 0.0, %v40_v11  ;;  %v52_v20 = vsub.f32 0.0, %v41_v12  ;;  %v53_v21 = vsel %vm44_vm0, %v45_v13, %v34_v5  ;;  %v54_v22 = vsel %vm44_vm0, %v46_v14, %v35_v6  ;;  %v243_v14 = vld [vmem:[%s573_s2] sm:$0xff]  ;;  %s280_s25 = sshll.u32 %s335_s24, 4  ;;  %s281_s25 = int_to_ptr.vmem [resolvable:$true] %s280_s25 }
   0x9   :  { %v55_v23 = vsel %vm44_vm0, %v47_v15, %v36_v7  ;;  %v56_v24 = vsel %vm44_vm0, %v48_v16, %v37_v8  ;;  %v57_v25 = vsel %vm44_vm0, %v49_v17, %v38_v9  ;;  %v58_v26 = vsel %vm44_vm0, %v50_v18, %v39_v10  ;;  %62 = vst.msk [vmem:[%s574_s3] sm:$0x7] %vm61_vm1, %v53_v21  ;;  %v244_v18 = vld [vmem:[%s573_s2 + $0x8] sm:$0xff]  ;;  %s309_s30 = scalar_lea.vmem %s281_s25, 512  ;;  %p314_p1 = scmp.lt.s32.totalorder %s281_s25, %s281_s25 }
   0xa   :  { %v59_v27 = vsel %vm44_vm0, %v51_v19, %v40_v11  ;;  %v60_v28 = vsel %vm44_vm0, %v52_v20, %v41_v12  ;;  %63 = vst.msk [vmem:[%s574_s3 + $0x4] sm:$0x7] %vm61_vm1, %v54_v22  ;;  %64 = vst.msk [vmem:[%s574_s3 + $0x8] sm:$0x7] %vm61_vm1, %v55_v23  ;;  %v79_v29 = vand.u32 127, %v42_v3  ;;  %vm203_vm2 = vcmp.eq.s32.totalorder %v43_v4, 0  ;;  %p310_p0 = scmp.ne.s32.totalorder %s281_s25, %s309_s30  ;;  %p315_p2 = scmp.lt.s32.totalorder %s309_s30, %s309_s30 }
   0xb   :  { %65 = vst.msk [vmem:[%s574_s3 + $0xc] sm:$0x7] %vm61_vm1, %v56_v24  ;;  %66 = vst.msk [vmem:[%s574_s3 + $0x10] sm:$0x7] %vm61_vm1, %v57_v25  ;;  %vm214_vm5 = vcmp.eq.s32.totalorder %v43_v4, 1  ;;  %vm224_vm7 = vcmp.eq.s32.totalorder %v43_v4, 2 }
   0xc   :  { %67 = vst.msk [vmem:[%s574_s3 + $0x14] sm:$0x7] %vm61_vm1, %v58_v26  ;;  %68 = vst.msk [vmem:[%s574_s3 + $0x18] sm:$0x7] %vm61_vm1, %v59_v27  ;;  %vm193_vm3 = vcmp.eq.s32.totalorder %v43_v4, %v79_v29  ;;  %vm204_vm4 = vcmp.eq.s32.totalorder %v79_v29, 2  ;;  %v131_v44 = vsub.s32 0, %v43_v4  ;;  %p316_p3 = por %p315_p2, %p314_p1 }
   0xd   :  { %69 = vst.msk [vmem:[%s574_s3 + $0x1c] sm:$0x7] %vm61_vm1, %v60_v28  ;;  %vm436_vm6 = vmand %vm193_vm3, %vm44_vm0  ;;  %v333_v34 = vmov 1966171168   ;;  %vm75_vm11 = vcmask 15360   ;;  %v334_v2 = vmov 32.0  }
   0xe   :  { %vm440_vm8 = vmand %vm203_vm2, %vm204_vm4  ;;  %v82_v35 = vunpack.c.l.s4 %v333_v34  ;;  %77 = vst.msk [vmem:[%s577_s6] sm:$0xff] %vm75_vm11, %v334_v2  ;;  %vm234_vm12 = vcmask 18432   ;;  %v245_v19 = vld [vmem:[%s573_s2 + $0x10] sm:$0xff]  ;;  %v246_v22 = vld [vmem:[%s573_s2 + $0x18] sm:$0xff]  ;;  %v296_v26 = vadd.f32 -32.0, %v243_v14  ;;  %v297_v29 = vadd.f32 -32.0, %v244_v18  ;;  %p317_p4 = pnand %p316_p3, %p310_p0 }
   0xf   :  { %vm444_vm9 = vmand %vm214_vm5, %vm204_vm4  ;;  %v298_v34 = vadd.f32 -32.0, %v245_v19 }
  0x10   :  { %vm448_vm10 = vmand %vm224_vm7, %vm204_vm4  ;;  %v83_v38 = vunpack.c.0.s8 %v82_v35 }
  0x12   :  { %v86_v41 = vsub.s32 %v83_v38, %v43_v4  ;;  %v299_v38 = vadd.f32 -32.0, %v246_v22 }
  0x76   :  { %v24_v36 = vpop.permute.xlu0 %23 }
  0x77   :  { %v26_v37 = vadd.f32 %v24_v36, %v21_v1 }
  0x79   :  { %v27_v39 = vmul.f32 0.5, %v26_v37 }
  0x7b   :  { %v28_v40 = vmax.f32 %v27_v39, 12.8 }
  0x7d   :  { %v29_v42 = vmin.f32 %v28_v40, 320.0 }
  0x7f   :  { %v87_v43 = vrot.slane %v29_v42, %v86_v41  ;;  %v80_v45 = vcombine.high %v29_v42, %v29_v42  ;;  %307 = vrcp.f32 %v29_v42 }
  0x81   :  { %v103_v46 = vrot.slane %v87_v43, %v86_v41  ;;  %v95_v47 = vcombine.high %v87_v43, %v87_v43  ;;  %v94_v48 = vrot.slane %v80_v45, %v86_v41 }
  0x83   :  { %v132_v49 = vrot.slane %v103_v46, %v131_v44  ;;  %v117_v50 = vrot.slane %v95_v47, %v86_v41  ;;  %v110_v51 = vrot.slane %v94_v48, %v86_v41  ;;  %v125_v53 = vcombine.high %v103_v46, %v103_v46 }
  0x84   :  { %v96_v58 = vcombine.high %v94_v48, %v94_v48 }
  0x85   :  { %162 = vperm.xlu0 %305, %v132_v49   ;;  %v136_v52 = vrot.slane %v117_v50, %v131_v44  ;;  %v148_v54 = vrot.slane %v110_v51, %v131_v44  ;;  %v126_v55 = vcombine.high %v110_v51, %v110_v51  ;;  %v127_v56 = vcombine.high %v117_v50, %v117_v50 }
  0x86   :  { %v140_v57 = vrot.slane %v125_v53, %v131_v44  ;;  %v124_v61 = vrot.slane %v96_v58, %v86_v41 }
  0x87   :  { %166 = vperm.xlu1 %306, %v136_v52   ;;  %v156_v59 = vrot.slane %v126_v55, %v131_v44  ;;  %v144_v60 = vrot.slane %v127_v56, %v131_v44 }
  0x88   :  { %v152_v63 = vrot.slane %v124_v61, %v131_v44  ;;  %v128_v0 = vcombine.high %v124_v61, %v124_v61 }
  0x89   :  { %178 = vperm.xlu0 %305, %v148_v54  }
  0x8a   :  { %v160_v1 = vrot.slane %v128_v0, %v131_v44 }
  0x8b   :  { %170 = vperm.xlu1 %306, %v140_v57  }
  0x8c   :  { %v308_v62 = vpop.eup %307 }
  0x8d   :  { %186 = vperm.xlu0 %305, %v156_v59  }
  0x8f   :  { %174 = vperm.xlu1 %306, %v144_v60  }
  0x91   :  { %255 = vperm.xlu0 %305, %v308_v62  }
  0x93   :  { %182 = vperm.xlu1 %306, %v152_v63  }
  0x97   :  { %190 = vperm.xlu1 %306, %v160_v1  }
  0x9b   :  { %72 = vperm.xlu1 %306, %v29_v42  }
 0x100   :  { %v163_v3 = vpop.permute.xlu0 %162 }
 0x101   :  { %v195_v4 = vsel %vm436_vm6, %v163_v3, 0.0 }
 0x102   :  { %v206_v5 = vsel %vm440_vm8, 32.0, %v195_v4  ;;  %v167_v6 = vpop.permute.xlu1 %166 }
 0x103   :  { %v216_v7 = vsel %vm444_vm9, 32.0, %v206_v5  ;;  %v196_v8 = vsel %vm436_vm6, %v167_v6, 0.0 }
 0x104   :  { %v226_v9 = vsel %vm448_vm10, 1.0, %v216_v7  ;;  %v207_v10 = vsel %vm440_vm8, 32.0, %v196_v8  ;;  %v179_v11 = vpop.permute.xlu0 %178 }
 0x105   :  { %235 = vst.msk [vmem:[%s575_s4] sm:$0x7] %vm234_vm12, %v226_v9  ;;  %v217_v12 = vsel %vm444_vm9, 32.0, %v207_v10  ;;  %v199_v13 = vsel %vm436_vm6, %v179_v11, 0.0 }
 0x106   :  { %v227_v15 = vsel %vm448_vm10, 1.0, %v217_v12  ;;  %v210_v16 = vsel %vm440_vm8, 32.0, %v199_v13  ;;  %v171_v17 = vpop.permute.xlu1 %170 }
 0x107   :  { %236 = vst.msk [vmem:[%s575_s4 + $0x4] sm:$0x7] %vm234_vm12, %v227_v15  ;;  %v220_v20 = vsel %vm444_vm9, 32.0, %v210_v16  ;;  %v197_v21 = vsel %vm436_vm6, %v171_v17, 0.0 }
 0x108   :  { %v230_v23 = vsel %vm448_vm10, 1.0, %v220_v20  ;;  %v208_v24 = vsel %vm440_vm8, 32.0, %v197_v21  ;;  %v187_v25 = vpop.permute.xlu0 %186 }
 0x109   :  { %239 = vst.msk [vmem:[%s575_s4 + $0x10] sm:$0x7] %vm234_vm12, %v230_v23  ;;  %v218_v27 = vsel %vm444_vm9, 32.0, %v208_v24  ;;  %v201_v28 = vsel %vm436_vm6, %v187_v25, 0.0 }
 0x10a   :  { %v228_v35 = vsel %vm448_vm10, 1.0, %v218_v27  ;;  %v212_v36 = vsel %vm440_vm8, 32.0, %v201_v28  ;;  %v175_v37 = vpop.permute.xlu1 %174 }
 0x10b   :  { %237 = vst.msk [vmem:[%s575_s4 + $0x8] sm:$0x7] %vm234_vm12, %v228_v35  ;;  %v222_v39 = vsel %vm444_vm9, 32.0, %v212_v36  ;;  %v198_v40 = vsel %vm436_vm6, %v175_v37, 0.0 }
 0x10c   :  { %v232_v41 = vsel %vm448_vm10, 1.0, %v222_v39  ;;  %v209_v42 = vsel %vm440_vm8, 32.0, %v198_v40  ;;  %v256_v43 = vpop.permute.xlu0 %255 }
 0x10d   :  { %241 = vst.msk [vmem:[%s575_s4 + $0x18] sm:$0x7] %vm234_vm12, %v232_v41  ;;  %v219_v44 = vsel %vm444_vm9, 32.0, %v209_v42  ;;  %v258_v45 = vmul.f32 %v296_v26, %v256_v43  ;;  %v259_v46 = vmul.f32 %v297_v29, %v256_v43  ;;  %v260_v47 = vmul.f32 %v298_v34, %v256_v43 }
 0x10e   :  { %v229_v48 = vsel %vm448_vm10, 1.0, %v219_v44  ;;  %v261_v49 = vmul.f32 %v299_v38, %v256_v43  ;;  %v183_v50 = vpop.permute.xlu1 %182 }
 0x10f   :  { %238 = vst.msk [vmem:[%s575_s4 + $0xc] sm:$0x7] %vm234_vm12, %v229_v48  ;;  %262 = vst [vmem:[#allocation2] sm:$0xff] %v258_v45  ;;  %v200_v51 = vsel %vm436_vm6, %v183_v50, 0.0 }
 0x110   :  { %263 = vst [vmem:[#allocation2 + $0x8] sm:$0xff] %v259_v46  ;;  %264 = vst [vmem:[#allocation2 + $0x10] sm:$0xff] %v260_v47  ;;  %v211_v52 = vsel %vm440_vm8, 32.0, %v200_v51 }
 0x111   :  { %265 = vst [vmem:[#allocation2 + $0x18] sm:$0xff] %v261_v49  ;;  %v221_v53 = vsel %vm444_vm9, 32.0, %v211_v52 }
 0x112   :  { %320 = shalt.err (!%p317_p4)
}
 0x113   :  { %283 = dma.vmem_to_hbm [thread:$0]  %s281_s25, 512, %s578_s7, [#allocation3]   ;;  %v231_v54 = vsel %vm448_vm10, 1.0, %v221_v53  ;;  %v191_v55 = vpop.permute.xlu1 %190 }
 0x114   :  { %240 = vst.msk [vmem:[%s575_s4 + $0x14] sm:$0x7] %vm234_vm12, %v231_v54  ;;  %v202_v56 = vsel %vm436_vm6, %v191_v55, 0.0 }
 0x115   :  { %v213_v57 = vsel %vm440_vm8, 32.0, %v202_v56 }
 0x116   :  { %v223_v58 = vsel %vm444_vm9, 32.0, %v213_v57 }
 0x117   :  { %v233_v59 = vsel %vm448_vm10, 1.0, %v223_v58  ;;  %v73_v60 = vpop.permute.xlu1 %72 }
 0x118   :  { %242 = vst.msk [vmem:[%s575_s4 + $0x1c] sm:$0x7] %vm234_vm12, %v233_v59 }
 0x119   :  { %76 = vst.msk [vmem:[%s576_s5] sm:$0xff] %vm75_vm11, %v73_v60 }
 0x11a   :  { %329 = dma.done.wait [#allocation3], 512  }
 0x11b   :  { %330 = vsyncadd [#allocation3], 4294966784 }
 0x11c   :  { %295 = vsyncpa [#allocation3], 1 }

</bundles_post_ra>
